<compile_context>
chip_gen: v5e
topology: v5e:2x2
jax: 0.10.0
libtpu: 0.0.40
codegen_flags: <defaults>
</compile_context>

<pallas_src>
import functools

import jax
import jax.numpy as jnp
from jax import lax
from jax.experimental import pallas as pl
from jax.experimental.pallas import tpu as pltpu

_EPS = 1e-6  # torch.nn.PairwiseDistance default eps


def _device_kind():
    try:
        return jax.devices()[0].device_kind.lower()
    except Exception:
        return ""


_IS_V7 = "v7" in _device_kind()
# Per-input block budget: ~4 MiB (v5e/v6e), ~8 MiB (v7x).  2 inputs x 2 pipeline buffers
# plus the tiny output block stays well under the 48 MiB scoped-VMEM limit requested.
_BLOCK_BYTES = (8 if _IS_V7 else 4) * 1024 * 1024
_VMEM_LIMIT = 48 * 1024 * 1024


def _l1_partial_kernel(g_ref, t_ref, o_ref, *, rows_full, grid_r, tm, group,
                       needs_mask, unroll):
    """Accumulates per-(sublane, lane) partial sums of |g - t + eps| over grid axis 1."""
    r = pl.program_id(1)

    @pl.when(r == 0)
    def _():
        o_ref[...] = jnp.zeros_like(o_ref)

    lanes = g_ref.shape[-1]
    n_groups = tm // group
    acc0 = jnp.zeros((group, lanes), jnp.float32)

    def load(i):
        start = pl.multiple_of(i * group, group)
        g = g_ref[pl.ds(start, group), :]
        t = t_ref[pl.ds(start, group), :]
        if g.dtype != jnp.float32:  # upcast only when needed (bf16/fp16 inputs)
            g = g.astype(jnp.float32)
            t = t.astype(jnp.float32)
        return start, g, t

    def full_step(i, acc):
        _, g, t = load(i)
        return acc + jnp.abs(g - t + _EPS)

    if not needs_mask:
        acc = lax.fori_loop(0, n_groups, full_step, acc0, unroll=unroll)
        o_ref[...] += acc[None]
    else:
        block_start = (pl.program_id(0) * grid_r + r) * tm
        is_full = block_start + tm <= rows_full

        @pl.when(is_full)
        def _():
            acc = lax.fori_loop(0, n_groups, full_step, acc0, unroll=unroll)
            o_ref[...] += acc[None]

        @pl.when(jnp.logical_not(is_full))
        def _():
            # Ragged (or fully out-of-bounds) block: zero out rows >= rows_full so the
            # unspecified OOB contents of the VMEM block contribute nothing.
            def masked_step(i, acc):
                start, g, t = load(i)
                row = (lax.broadcasted_iota(jnp.int32, (group, lanes), 0)
                       + block_start + start)
                val = jnp.abs(g - t + _EPS)
                return acc + jnp.where(row < rows_full, val, 0.0)

            acc = lax.fori_loop(0, n_groups, masked_step, acc0, unroll=unroll)
            o_ref[...] += acc[None]


@functools.partial(jax.jit, static_argnames=("lambda_l1",))
def l1_loss(generated, image_gt, lambda_l1):
    assert generated.shape == image_gt.shape
    *lead, w = generated.shape
    m_pairs = 1
    for d in lead:
        m_pairs *= d
    total = m_pairs * w

    itemsize = generated.dtype.itemsize
    group = max(8, 32 // itemsize)  # sublane group: 8 for f32, 16 for bf16/fp16

    # Widest lane count that divides `total` (so the 2-D view is a free reshape,
    # no HBM copy) and still leaves >= `group` rows.
    lanes = 128
    for cand in (1024, 512, 256):
        if total % cand == 0 and total // cand >= group:
            lanes = cand
            break

    rows_full = total // lanes
    rem = total - rows_full * lanes

    g_flat = generated.reshape(-1)
    t_flat = image_gt.reshape(-1)

    # Tiny inputs: pallas_call launch overhead dominates and block_shape > array_dim
    # corner cases appear; pure jnp is the right tool there.
    if rows_full < group:
        total_sum = jnp.sum(
            jnp.abs(g_flat.astype(jnp.float32) - t_flat.astype(jnp.float32) + _EPS))
        return (lambda_l1 * total_sum / jnp.float32(m_pairs)).astype(jnp.float32)

    if rem == 0:
        g_body, t_body = g_flat, t_flat      # pure reshape below: no copy
    else:
        # TODO(synk): this prefix slice copies the inputs once in HBM; only hit when
        # the total element count is not a multiple of 128.
        g_body = lax.slice(g_flat, (0,), (rows_full * lanes,))
        t_body = lax.slice(t_flat, (0,), (rows_full * lanes,))
    g2 = g_body.reshape(rows_full, lanes)
    t2 = t_body.reshape(rows_full, lanes)

    # Row tile: multiple of `group`, <= rows_full, capped so each input block is about
    # _BLOCK_BYTES (sized against f32, the accumulation dtype, for bf16 safety).
    tm_cap = max(group, (_BLOCK_BYTES // (lanes * 4)) // group * group)
    tm = min(tm_cap, (rows_full // group) * group)

    num_blocks = pl.cdiv(rows_full, tm)
    n_partial = 2 if num_blocks >= 2 else 1          # 2 partials -> both TCs on v7x
    grid_r = pl.cdiv(num_blocks, n_partial)
    needs_mask = (n_partial * grid_r * tm != rows_full)
    unroll = max(1, min(4, tm // group))

    if _IS_V7 and n_partial == 2:
        dim_sem = (pltpu.CORE_PARALLEL, pltpu.ARBITRARY)   # split across the 2 TCs
    else:
        dim_sem = ("parallel", "arbitrary")

    kernel = functools.partial(
        _l1_partial_kernel, rows_full=rows_full, grid_r=grid_r, tm=tm,
        group=group, needs_mask=needs_mask, unroll=unroll)

    partials = pl.pallas_call(
        kernel,
        out_shape=jax.ShapeDtypeStruct((n_partial, group, lanes), jnp.float32),
        grid_spec=pltpu.PrefetchScalarGridSpec(
            num_scalar_prefetch=0,
            grid=(n_partial, grid_r),
            in_specs=[
                pl.BlockSpec((tm, lanes), lambda p, r: (p * grid_r + r, 0)),
                pl.BlockSpec((tm, lanes), lambda p, r: (p * grid_r + r, 0)),
            ],
            out_specs=pl.BlockSpec((1, group, lanes), lambda p, r: (p, 0, 0)),
        ),
        compiler_params=pltpu.CompilerParams(
            dimension_semantics=dim_sem,
            vmem_limit_bytes=_VMEM_LIMIT,
        ),
        cost_estimate=pl.CostEstimate(
            flops=3 * rows_full * lanes,
            transcendentals=0,
            bytes_accessed=2 * rows_full * lanes * itemsize,
        ),
    )(g2, t2)

    # Single cross-lane reduce + (tiny) ragged tail, mean over pairs, scale by lambda.
    total_sum = jnp.sum(partials, dtype=jnp.float32)
    if rem:
        g_tail = lax.slice(g_flat, (rows_full * lanes,), (total,)).astype(jnp.float32)
        t_tail = lax.slice(t_flat, (rows_full * lanes,), (total,)).astype(jnp.float32)
        total_sum = total_sum + jnp.sum(jnp.abs(g_tail - t_tail + _EPS))

    return (lambda_l1 * total_sum / jnp.float32(m_pairs)).astype(jnp.float32)


if __name__ == "__main__":
    key = jax.random.PRNGKey(0)
    k1, k2 = jax.random.split(key)

    # Small NCHW images: batch=2, channels=4, spatial=16x16.
    generated = jax.random.normal(k1, (2, 4, 16, 16), dtype=jnp.float32)
    image_gt = jax.random.normal(k2, (2, 4, 16, 16), dtype=jnp.float32)
    lambda_l1 = 10.0  # deterministic constructor argument

    loss = l1_loss(generated, image_gt, lambda_l1)
    jax.block_until_ready(loss)

    # Pure-JAX reference of the PairwiseDistance(p=1) + mean semantics.
    ref = lambda_l1 * jnp.mean(
        jnp.sum(jnp.abs(generated - image_gt + _EPS), axis=-1)
    )
    assert jnp.allclose(loss, ref, rtol=1e-5, atol=1e-5), (loss, ref)

    print("KERNEL_OK")
</pallas_src>

<mosaic_0001>
module attributes {stable_mosaic.version = 11 : i64} {
  func.func @_l1_partial_kernel(%arg0: i32, %arg1: i32, %arg2: memref<8x256xf32, #tpu.memory_space<vmem>>, %arg3: memref<8x256xf32, #tpu.memory_space<vmem>>, %arg4: memref<1x8x256xf32, #tpu.memory_space<vmem>>) attributes {dimension_semantics = [#tpu.dimension_semantics<parallel>, #tpu.dimension_semantics<arbitrary>], iteration_bounds = array<i64: 1, 1>, scalar_prefetch = 0 : i64, scratch_operands = 0 : i64, tpu.core_type = #tpu.core_type<tc>, window_params = [{transform_indices = @transform_0, window_bounds = array<i64: 8, 256>}, {transform_indices = @transform_1, window_bounds = array<i64: 8, 256>}, {transform_indices = @transform_2, window_bounds = array<i64: 1, 8, 256>}]} {
    %c0_i32 = arith.constant 0 : i32
    %0 = arith.cmpi eq, %arg1, %c0_i32 : i32
    %1 = arith.extui %0 : i1 to i32
    %c0_i32_0 = arith.constant 0 : i32
    %2 = arith.cmpi ne, %1, %c0_i32_0 : i32
    scf.if %2 {
      %cst_10 = arith.constant 0.000000e+00 : f32
      %19 = vector.broadcast %cst_10 : f32 to vector<1x8x256xf32>
      %c0_11 = arith.constant 0 : index
      %c0_12 = arith.constant 0 : index
      %c0_13 = arith.constant 0 : index
      %20 = vector.load %arg4[%c0_11, %c0_12, %c0_13] : memref<1x8x256xf32, #tpu.memory_space<vmem>>, vector<1x8x256xf32>
      tpu.vector_store %arg4[%c0_11, %c0_12, %c0_13], %19 {strides = array<i32>} : memref<1x8x256xf32, #tpu.memory_space<vmem>>, vector<1x8x256xf32>,
    } else {
    }
    %cst = arith.constant 0.000000e+00 : f32
    %3 = vector.broadcast %cst : f32 to vector<8x256xf32>
    %c0_i32_1 = arith.constant 0 : i32
    %c8_i32 = arith.constant 8 : i32
    %4 = arith.muli %c0_i32_1, %c8_i32 : i32
    %5 = tpu.assume_multiple %4, 8 : i32
    %6 = arith.index_cast %5 : i32 to index
    %c0 = arith.constant 0 : index
    %7 = vector.load %arg2[%6, %c0] : memref<8x256xf32, #tpu.memory_space<vmem>>, vector<8x256xf32>
    %8 = arith.index_cast %5 : i32 to index
    %c0_2 = arith.constant 0 : index
    %9 = vector.load %arg3[%8, %c0_2] : memref<8x256xf32, #tpu.memory_space<vmem>>, vector<8x256xf32>
    %10 = arith.subf %7, %9 : vector<8x256xf32>
    %cst_3 = arith.constant 9.99999997E-7 : f32
    %11 = vector.broadcast %cst_3 : f32 to vector<8x256xf32>
    %12 = arith.addf %10, %11 : vector<8x256xf32>
    %13 = math.absf %12 : vector<8x256xf32>
    %14 = arith.addf %3, %13 : vector<8x256xf32>
    %c1_i32 = arith.constant 1 : i32
    %c0_4 = arith.constant 0 : index
    %c0_5 = arith.constant 0 : index
    %c0_6 = arith.constant 0 : index
    %15 = vector.load %arg4[%c0_4, %c0_5, %c0_6] : memref<1x8x256xf32, #tpu.memory_space<vmem>>, vector<1x8x256xf32>
    %16 = vector.shape_cast %14 : vector<8x256xf32> to vector<1x8x256xf32>
    %17 = arith.addf %15, %16 : vector<1x8x256xf32>
    %c0_7 = arith.constant 0 : index
    %c0_8 = arith.constant 0 : index
    %c0_9 = arith.constant 0 : index
    %18 = vector.load %arg4[%c0_7, %c0_8, %c0_9] : memref<1x8x256xf32, #tpu.memory_space<vmem>>, vector<1x8x256xf32>
    tpu.vector_store %arg4[%c0_7, %c0_8, %c0_9], %17 {strides = array<i32>} : memref<1x8x256xf32, #tpu.memory_space<vmem>>, vector<1x8x256xf32>,
    return
  }
  func.func @transform_0(%arg0: i32, %arg1: i32) -> (i32, i32) {
    %c1_i32 = arith.constant 1 : i32
    %0 = arith.muli %arg0, %c1_i32 : i32
    %1 = arith.addi %0, %arg1 : i32
    %c0_i32 = arith.constant 0 : i32
    %c0_i32_0 = arith.constant 0 : i32
    return %1, %c0_i32 : i32, i32
  }
  func.func @transform_1(%arg0: i32, %arg1: i32) -> (i32, i32) {
    %c1_i32 = arith.constant 1 : i32
    %0 = arith.muli %arg0, %c1_i32 : i32
    %1 = arith.addi %0, %arg1 : i32
    %c0_i32 = arith.constant 0 : i32
    %c0_i32_0 = arith.constant 0 : i32
    return %1, %c0_i32 : i32, i32
  }
  func.func @transform_2(%arg0: i32, %arg1: i32) -> (i32, i32, i32) {
    %c0_i32 = arith.constant 0 : i32
    %c0_i32_0 = arith.constant 0 : i32
    %c0_i32_1 = arith.constant 0 : i32
    return %arg0, %c0_i32, %c0_i32_0 : i32, i32, i32
  }
}

</mosaic_0001>

<bundles_post_ra>
// kernel: l1_loss.1
= control target key start
LH: loop header
LB: loop body
LE: loop exit
PB: predicated region body
PF: predicated region fallthrough
CT: control target
= control target key end

     0   :  { %s130_s0 = inlined_call_operand.vmem [shape: f32[8,256], index: 0, kind: input, shape index: {}]   ;;  %s131_s1 = inlined_call_operand.vmem [shape: f32[8,256], index: 1, kind: input, shape index: {}]   ;;  %s132_s2 = inlined_call_operand.vmem [shape: f32[1,8,256], index: 2, kind: output, shape index: {}]  }
   0x1   :  { %v60_v0 = vld [vmem:[%s130_s0] sm:$0xff]  ;;  %v61_v2 = vld [vmem:[%s130_s0 + $0x8] sm:$0xff] }
   0x2   :  { %v64_v1 = vld [vmem:[%s131_s1] sm:$0xff]  ;;  %v65_v4 = vld [vmem:[%s131_s1 + $0x8] sm:$0xff] }
   0x3   :  { %v66_v3 = vsub.f32 %v60_v0, %v64_v1  ;;  %v67_v5 = vsub.f32 %v61_v2, %v65_v4 }
   0x5   :  { %v68_v6 = vadd.f32 1e-06, %v66_v3  ;;  %v69_v7 = vadd.f32 1e-06, %v67_v5 }
   0x7   :  { %v70_v8 = vand.u32 2147483647, %v68_v6  ;;  %v71_v9 = vand.u32 2147483647, %v69_v7 }
   0x9   :  { %78 = vst [vmem:[%s132_s2] sm:$0xff] %v70_v8 }
   0xa   :  { %79 = vst [vmem:[%s132_s2 + $0x8] sm:$0xff] %v71_v9 }

</bundles_post_ra>
